<compile_context>
chip_gen: v7x
topology: tpu7x:2x2x1
jax: 0.10.0
libtpu: 0.0.40
codegen_flags: <defaults>
</compile_context>

<pallas_src>
import functools

import jax
import jax.numpy as jnp
from jax.experimental import pallas as pl
from jax.experimental.pallas import tpu as pltpu


def _cnn_kernel(x_ref, w_ref, b_ref, o_ref, *, filters: int, t_out: int, use_tree: bool):
    """x_ref: (TB, C*L) f32; w_ref: (C*L, Wp) bf16; b_ref: (1, F) f32; o_ref: (TB, F) f32."""
    x = x_ref[...].astype(jnp.bfloat16)                  # cast in-register; no wrapper pass
    conv = jnp.dot(x, w_ref[...],
                   preferred_element_type=jnp.float32)   # (TB, Wp) fp32 accumulate
    wp = conv.shape[1]

    if use_tree:
        # (a) fold 128-lane-aligned blocks with plain vreg maxima (no lane shuffles).
        #     Padding groups are duplicates of real time-groups, so they never win the max.
        m = conv[:, 0:128]
        for i in range(1, wp // 128):
            m = jnp.maximum(m, conv[:, i * 128:(i + 1) * 128])
        # (b) log2 roll/max tree within one vreg: lane p ends with the max over every lane
        #     of the same phase (p mod F), i.e. the max over all time groups.
        s = 64
        while s >= filters:
            m = jnp.maximum(m, pltpu.roll(m, s, 1))
            s //= 2
        m = m[:, 0:filters]
    else:
        # Fallback (F does not divide 128): simple chain over the T_out lane groups.
        m = conv[:, 0:filters]
        for t in range(1, t_out):
            m = jnp.maximum(m, conv[:, t * filters:(t + 1) * filters])

    # Bias after the max (bias is constant over time) + ReLU, all fp32.
    o_ref[...] = jnp.maximum(m + b_ref[...], 0.0).astype(o_ref.dtype)


def _toeplitz_weight(weight, word_len):
    """(F, C, K) Conv1d weight -> (C*L, T_out*F) banded matrix matching NCW-flattened x.

    Wt[c*L + l, t*F + f] = weight[f, c, l - t]  if 0 <= l - t < K else 0
    """
    f_out, c_in, k = weight.shape
    t_out = word_len - k + 1
    wk = jnp.transpose(weight, (2, 1, 0))                               # (K, C, F)
    tap = jnp.arange(word_len)[None, :] - jnp.arange(t_out)[:, None]    # (T_out, L)
    valid = (tap >= 0) & (tap < k)
    w_tlcf = jnp.where(valid[:, :, None, None],
                       wk[jnp.clip(tap, 0, k - 1)], 0.0)                # (T_out, L, C, F)
    return jnp.transpose(w_tlcf, (2, 1, 0, 3)).reshape(c_in * word_len, t_out * f_out)


def cnn_forward(x_nct, weight, bias, *, block_b: int = 2048):
    """Pallas forward pass.

    Args:
      x_nct:  (B, char_embed, word_len)  -- PyTorch NCW layout.
      weight: (filters, char_embed, K)   -- PyTorch Conv1d weight layout.
      bias:   (filters,)
    Returns:
      (B, filters) float32
    """
    B, C, L = x_nct.shape
    F_out, C_w, K = weight.shape
    assert C == C_w
    assert L >= K, "word_len must be >= kernel_size (Conv1d 'VALID' output empty)"
    t_out = L - K + 1
    cl = C * L

    # Tree reduction is possible whenever F divides 128 (then group boundaries align
    # identically inside every 128-lane block).
    use_tree = (F_out <= 128) and (128 % F_out == 0)
    real_cols = t_out * F_out
    if use_tree:
        gpv = 128 // F_out                                  # groups per 128-lane vreg
        g_pad = ((t_out + gpv - 1) // gpv) * gpv
        w_cols = g_pad * F_out                              # multiple of 128
    else:
        w_cols = ((real_cols + 127) // 128) * 128

    w_real = _toeplitz_weight(weight.astype(jnp.float32), L)
    if w_cols > real_cols:
        if use_tree:
            # Pad with DUPLICATE time-groups (phase-preserving), so they never affect the max.
            src = jnp.arange(real_cols, w_cols) % real_cols
            w_full = jnp.concatenate([w_real, w_real[:, src]], axis=1)
        else:
            w_full = jnp.pad(w_real, ((0, 0), (0, w_cols - real_cols)))
    else:
        w_full = w_real
    w_full = w_full.astype(jnp.bfloat16)
    b2 = bias.astype(jnp.float32).reshape(1, F_out)

    # Native NCW flattening — a free (metadata-only) reshape, no relayout / HBM pass.
    x_flat = x_nct.reshape(B, cl)

    # Batch tile: multiple of 8 sublanes; >= 2 grid steps whenever B > 8 so both v7x
    # TensorCores are used; large default cap amortizes per-grid-step overhead.
    if B <= 8:
        tb = B
    else:
        tb = min(block_b, ((pl.cdiv(B, 2) + 7) // 8) * 8)
    grid = (pl.cdiv(B, tb),)

    kern = functools.partial(_cnn_kernel, filters=F_out, t_out=t_out, use_tree=use_tree)

    return pl.pallas_call(
        kern,
        out_shape=jax.ShapeDtypeStruct((B, F_out), jnp.float32),
        grid=grid,
        in_specs=[
            pl.BlockSpec((tb, cl), lambda i: (i, 0)),        # x: tiled over batch
            pl.BlockSpec((cl, w_cols), lambda i: (0, 0)),    # Toeplitz weight: resident
            pl.BlockSpec((1, F_out), lambda i: (0, 0)),      # bias: resident
        ],
        out_specs=pl.BlockSpec((tb, F_out), lambda i: (i, 0)),
        compiler_params=pltpu.CompilerParams(
            dimension_semantics=("parallel",),               # shard batch grid across TCs
        ),
    )(x_flat, w_full, b2)


def cnn_reference(x_nct, weight, bias):
    """Plain-JAX reference matching the PyTorch module (sanity check)."""
    conv = jax.lax.conv_general_dilated(
        x_nct, weight,
        window_strides=(1,), padding="VALID",
        dimension_numbers=("NCH", "OIH", "NCH"),
    ) + bias[None, :, None]
    return jax.nn.relu(jnp.max(conv, axis=2))


if __name__ == "__main__":
    # Small, module-consistent shapes (B=16 exercises the 2-step batch grid).
    batch_size = 16
    char_embed = 8      # e_char
    word_len = 16       # m_word
    filters = 16        # e_word / f_embed
    kernel_size = 5

    key = jax.random.PRNGKey(0)
    kx, kw, kb = jax.random.split(key, 3)

    x = jax.random.normal(kx, (batch_size, char_embed, word_len), dtype=jnp.float32)
    weight = jax.random.normal(
        kw, (filters, char_embed, kernel_size), dtype=jnp.float32) * 0.1
    bias = jax.random.normal(kb, (filters,), dtype=jnp.float32) * 0.1

    out = jax.block_until_ready(cnn_forward(x, weight, bias))
    ref = jax.block_until_ready(cnn_reference(x, weight, bias))

    assert out.shape == (batch_size, filters)
    # bf16 operands on the MXU -> slightly looser tolerance than pure fp32.
    assert jnp.allclose(out, ref, atol=5e-2, rtol=5e-2), "mismatch vs reference"

    print("KERNEL_OK")
</pallas_src>

<mosaic_0001>
module attributes {stable_mosaic.version = 11 : i64} {
  func.func @_cnn_kernel(%arg0: i32, %arg1: memref<8x128xf32, #tpu.memory_space<vmem>>, %arg2: memref<128x256xbf16, #tpu.memory_space<vmem>>, %arg3: memref<1x16xf32, #tpu.memory_space<vmem>>, %arg4: memref<8x16xf32, #tpu.memory_space<vmem>>) attributes {dimension_semantics = [#tpu.dimension_semantics<parallel>], iteration_bounds = array<i64: 2>, scalar_prefetch = 0 : i64, scratch_operands = 0 : i64, tpu.core_type = #tpu.core_type<tc>, window_params = [{transform_indices = @transform_0, window_bounds = array<i64: 8, 128>}, {pipeline_mode = #tpu.pipeline_mode<synchronous>, transform_indices = @transform_1, window_bounds = array<i64: 128, 256>}, {pipeline_mode = #tpu.pipeline_mode<synchronous>, transform_indices = @transform_2, window_bounds = array<i64: 1, 16>}, {transform_indices = @transform_3, window_bounds = array<i64: 8, 16>}]} {
    %c0 = arith.constant 0 : index
    %c0_0 = arith.constant 0 : index
    %0 = vector.load %arg1[%c0, %c0_0] : memref<8x128xf32, #tpu.memory_space<vmem>>, vector<8x128xf32>
    %1 = arith.truncf %0 : vector<8x128xf32> to vector<8x128xbf16>
    %c0_1 = arith.constant 0 : index
    %c0_2 = arith.constant 0 : index
    %2 = vector.load %arg2[%c0_1, %c0_2] : memref<128x256xbf16, #tpu.memory_space<vmem>>, vector<128x256xbf16>
    %cst = arith.constant dense<0.000000e+00> : vector<8x256xf32>
    %3 = tpu.matmul %1, %2, %cst {dimension_numbers = #tpu.dot_dimension_numbers<[1], [0], [0], [1], [0, 0, 1, 1], [], []>} : vector<8x128xbf16>, vector<128x256xbf16>, vector<8x256xf32> -> vector<8x256xf32>
    %4 = vector.extract_strided_slice %3 {offsets = [0, 0], sizes = [8, 128], strides = [1, 1]} : vector<8x256xf32> to vector<8x128xf32>
    %5 = vector.extract_strided_slice %3 {offsets = [0, 128], sizes = [8, 128], strides = [1, 1]} : vector<8x256xf32> to vector<8x128xf32>
    %6 = arith.maximumf %4, %5 : vector<8x128xf32>
    %c64_i32 = arith.constant 64 : i32
    %7 = tpu.dynamic_rotate %6 by %c64_i32 dim 1 : vector<8x128xf32>, i32 -> vector<8x128xf32>
    %8 = arith.maximumf %6, %7 : vector<8x128xf32>
    %c32_i32 = arith.constant 32 : i32
    %9 = tpu.dynamic_rotate %8 by %c32_i32 dim 1 : vector<8x128xf32>, i32 -> vector<8x128xf32>
    %10 = arith.maximumf %8, %9 : vector<8x128xf32>
    %c16_i32 = arith.constant 16 : i32
    %11 = tpu.dynamic_rotate %10 by %c16_i32 dim 1 : vector<8x128xf32>, i32 -> vector<8x128xf32>
    %12 = arith.maximumf %10, %11 : vector<8x128xf32>
    %13 = vector.extract_strided_slice %12 {offsets = [0, 0], sizes = [8, 16], strides = [1, 1]} : vector<8x128xf32> to vector<8x16xf32>
    %c0_3 = arith.constant 0 : index
    %c0_4 = arith.constant 0 : index
    %14 = vector.load %arg3[%c0_3, %c0_4] : memref<1x16xf32, #tpu.memory_space<vmem>>, vector<1x16xf32>
    %15 = vector.broadcast %14 : vector<1x16xf32> to vector<8x16xf32>
    %16 = arith.addf %13, %15 : vector<8x16xf32>
    %cst_5 = arith.constant 0.000000e+00 : f32
    %17 = vector.broadcast %cst_5 : f32 to vector<8x16xf32>
    %18 = arith.maximumf %16, %17 : vector<8x16xf32>
    %c0_6 = arith.constant 0 : index
    %c0_7 = arith.constant 0 : index
    %19 = vector.load %arg4[%c0_6, %c0_7] : memref<8x16xf32, #tpu.memory_space<vmem>>, vector<8x16xf32>
    tpu.vector_store %arg4[%c0_6, %c0_7], %18 {strides = array<i32>} : memref<8x16xf32, #tpu.memory_space<vmem>>, vector<8x16xf32>,
    return
  }
  func.func @transform_0(%arg0: i32) -> (i32, i32) {
    %c0_i32 = arith.constant 0 : i32
    %c0_i32_0 = arith.constant 0 : i32
    return %arg0, %c0_i32 : i32, i32
  }
  func.func @transform_1(%arg0: i32) -> (i32, i32) {
    %c0_i32 = arith.constant 0 : i32
    %c0_i32_0 = arith.constant 0 : i32
    %c0_i32_1 = arith.constant 0 : i32
    return %c0_i32, %c0_i32_0 : i32, i32
  }
  func.func @transform_2(%arg0: i32) -> (i32, i32) {
    %c0_i32 = arith.constant 0 : i32
    %c0_i32_0 = arith.constant 0 : i32
    %c0_i32_1 = arith.constant 0 : i32
    return %c0_i32, %c0_i32_0 : i32, i32
  }
  func.func @transform_3(%arg0: i32) -> (i32, i32) {
    %c0_i32 = arith.constant 0 : i32
    %c0_i32_0 = arith.constant 0 : i32
    return %arg0, %c0_i32 : i32, i32
  }
}

</mosaic_0001>

<bundles_post_ra>
// kernel: tpu_custom_call.1
= control target key start
LH: loop header
LB: loop body
LE: loop exit
PB: predicated region body
PF: predicated region fallthrough
CT: control target
= control target key end

     0   :  { %8 = vsyncpa [#allocation3], 0  ;;  %s939_s0 = inlined_call_operand.hbm [shape: f32[16,128], index: 0, kind: input, shape index: {}]   ;;  %s940_s1 = inlined_call_operand.hbm [shape: bf16[128,256], index: 1, kind: input, shape index: {}]   ;;  %s941_s2 = inlined_call_operand.vmem [shape: f32[1,16], index: 2, kind: input, shape index: {}]   ;;  %s942_s3 = inlined_call_operand.hbm [shape: f32[16,16], index: 3, kind: output, shape index: {}]  }
   0x1   :  { %10 = vsyncpa [#allocation3 + $0x1], 0 }
   0x2   :  { %11 = vsyncpa [#allocation6], 0 }
   0x3   :  { %12 = vsyncpa [#allocation4], 0 }
   0x4   :  { %14 = vsyncpa [#allocation4 + $0x1], 0  ;;  %s733_s12 = smov 0   ;;  %s735_s13 = smov 0  }
   0x5   :  { %s737_s14 = smov 0   ;;  %s739_s15 = smov 0  }
   0x6 LB: > { %s754_s16 = sadd.s32 4294967295, %s702_s15   ;;  %s456_s17 = sadd.s32 4294967294, %s702_s15   ;;  %s702_s15 = sphi %s739_s15, %s962_s15   ;;  %s698_s14 = sphi %s737_s14, %s961_s14   ;;  %s694_s13 = sphi %s735_s13, %s960_s13   ;;  %s690_s12 = sphi %s733_s12, %s959_s12  }
   0x7   : > { %p40_p0 = scmp.ne.s32.totalorder %s694_s13, %s690_s12  ;;  %p943_p1 = scmp.eq.s32.totalorder %s754_s16, 0 }
   0x8   : > { %p112_p3 = scmp.eq.s32.totalorder %s456_s17, 1  ;;  %p457_p5 = scmp.ge.s32.totalorder %s702_s15, 1 }
   0x9   : > { %p763_p4 = por %p943_p1, %p40_p0  ;;  %p119_p7 = scmp.lt.s32.totalorder %s702_s15, 3 }
   0xa   : > { %p768_p6 = por %p112_p3, %p40_p0  ;;  %s704_s21 = smov [#allocation5]  }
   0xb   : > { %s946_s18 = scalar_select %p763_p4, 1, 0 }
   0xc   : > { %s947_s19 = scalar_select %p768_p6, 1, 0 }
   0xd   : > { %p773_p8 = pnand %p457_p5, %p119_p7  ;;  %s131_s22 = sshll.u32 %s704_s21, 4  ;;  %s777_s22 = int_to_ptr.vmem [resolvable:$true] %s131_s22 }
   0xe   : > { %s789_s24 = sadd.s32 1, %s702_s15   ;;  %s27_s25 = sadd.s32 1, %s698_s14 }
   0xf   : > { %s948_s20 = scalar_select %p773_p8, 1, 0 }
  0x10   : > { %p495_p9 = pneg %p773_p8  ;;  %s24_s26 = ssub.s32 %s702_s15, %s789_s24 }
  0x11   : > { %s574_s29 = scalar_lea.hbm %s940_s1, 2048 }
  0x12   : > { %p784_p11 = pnand %p495_p9, %p943_p1  ;;  %p575_p12 = scmp.ne.s32.totalorder %s940_s1, %s574_s29 }
  0x13   : > { %p581_p5 = scmp.lt.u32.totalorder %s574_s29, %s940_s1 }
  0x14   : > { %p576_p13 = pneg %p784_p11 }
  0x16   : > { %p577_p0 = pnand %p576_p13, %p575_p12 }
  0x18   : > { %p578_p3 = pneg %p577_p0 }
  0x1a   : > { %p583_p7 = pnand %p581_p5, %p578_p3 }
  0x1c   : > { %586 = shalt.err (!%p583_p7)
}
  0x1d   : > { %s587_s7 = scalar_lea.vmem %s777_s22, 2048  ;;  %p595_p2 = scmp.lt.s32.totalorder %s777_s22, %s777_s22 }
  0x1e   : > { %p588_p9 = scmp.ne.s32.totalorder %s777_s22, %s587_s7  ;;  %p596_p6 = scmp.lt.s32.totalorder %s587_s7, %s587_s7 }
  0x20   : > { %p590_p10 = pnand %p588_p9, %p576_p13  ;;  %p597_p4 = por %p596_p6, %p595_p2 }
  0x22   : > { %p591_p1 = pneg %p590_p10 }
  0x24   : > { %p598_p8 = pnand %p597_p4, %p591_p1 }
  0x26   : > { %601 = shalt.err (!%p598_p8)
}
  0x27   : > { %s705_s8 = smov 128   ;;  %s706_s9 = smov 8  }
  0x28   : > { %498 = dma.hbm_to_vmem [thread:$0]  (!%p784_p11), %s940_s1, 2048, %s777_s22, [#allocation6], %s705_s8, %s705_s8, %s706_s9  }
  0x29   : > { %p25_p2 = scmp.eq.s32.totalorder %s24_s26, 0  ;;  %p34_p1 = scmp.ne.s32.totalorder %s698_s14, %s694_s13 }
  0x2a   : > { %p35_p4 = scmp.eq.s32.totalorder %s702_s15, 0  ;;  %p508_p6 = scmp.lt.s32.totalorder %s702_s15, 2 }
  0x2b   : > { %s820_s17 = scalar_select %p25_p2, %s698_s14, %s27_s25  }
  0x2c   : > { %p36_p8 = por %p35_p4, %p34_p1  ;;  %p950_p10 = scmp.eq.s32.totalorder %s754_s16, 1 }
  0x2d   : > { %s148_s27 = sand.u32 1, %s698_s14   ;;  %s461_s28 = sshll.u32 %s702_s15, 7 }
  0x2e   : > { %p824_p12 = por %p950_p10, %p34_p1  ;;  %s460_s29 = sshll.u32 %s148_s27, 3 }
  0x2f   : > { %s833_s4 = scalar_lea.hbm %s939_s0, %s461_s28  ;;  %s152_s22 = scalar_lea.vmem [#allocation2], %s460_s29 }
  0x30   : > { %s159_s25 = sshll.u32 %s152_s22, 4  ;;  %p835_p11 = pnand %p508_p6, %p36_p8  ;;  %s839_s25 = int_to_ptr.vmem [resolvable:$true] %s159_s25 }
  0x31   : > { %s149_s5 = scalar_lea.sflag [#allocation3], %s148_s27  ;;  %s602_s6 = scalar_lea.hbm %s833_s4, 128 }
  0x32   : > { %p603_p13 = scmp.ne.s32.totalorder %s833_s4, %s602_s6  ;;  %p604_p0 = pneg %p835_p11 }
  0x33   : > { %s607_s9 = scalar_lea.hbm %s939_s0, 256  ;;  %p608_p7 = scmp.lt.u32.totalorder %s833_s4, %s939_s0 }
  0x34   : > { %p605_p3 = pnand %p604_p0, %p603_p13  ;;  %p609_p9 = scmp.lt.u32.totalorder %s607_s9, %s602_s6 }
  0x35   : > { %p611_p1 = scmp.lt.u32.totalorder %s602_s6, %s833_s4 }
  0x36   : > { %p606_p5 = pneg %p605_p3  ;;  %p610_p2 = por %p609_p9, %p608_p7 }
  0x38   : > { %p612_p4 = por %p611_p1, %p610_p2 }
  0x3a   : > { %p613_p6 = pnand %p612_p4, %p606_p5 }
  0x3c   : > { %616 = shalt.err (!%p613_p6)
}
  0x3d   : > { %s617_s27 = scalar_lea.vmem %s839_s25, 128  ;;  %s707_s28 = smov [#allocation2]  }
  0x3e   : > { %p618_p8 = scmp.ne.s32.totalorder %s839_s25, %s617_s27  ;;  %s622_s29 = sshll.u32 %s707_s28, 4  ;;  %s623_s29 = int_to_ptr.vmem [resolvable:$false] %s622_s29 }
  0x3f   : > { %s624_s23 = scalar_lea.vmem %s623_s29, 256  ;;  %p625_p3 = scmp.lt.s32.totalorder %s839_s25, %s623_s29 }
  0x40   : > { %p620_p10 = pnand %p618_p8, %p604_p0  ;;  %p626_p7 = scmp.lt.s32.totalorder %s624_s23, %s617_s27 }
  0x42   : > { %p621_p13 = pneg %p620_p10  ;;  %p627_p9 = por %p626_p7, %p625_p3 }
  0x44   : > { %p628_p2 = pnand %p627_p9, %p621_p13 }
  0x46   : > { %631 = shalt.err (!%p628_p2)
}
  0x47   : > { %502 = dma.hbm_to_vmem [thread:$0]  (!%p835_p11), %s833_s4, 128, %s839_s25, %s149_s5  }
  0x48   : > { %p953_p5 = scmp.ne.s32.totalorder %s948_s20, 0 }
  0x49   : > { %s869_s30 = sand.u32 (!%p953_p5), 1, %s694_s13   ;;  %p954_p0 = scmp.ne.s32.totalorder (!%p953_p5), %s946_s18, 0 }
  0x4a   : > { %168 = sbr.rel (%p953_p5) target bundleno = 702 (0x2be), region = 32  ;;  %s463_s22 = sshll.u32 (!%p953_p5), %s869_s30, 3 }
  0x4b   : > { %s171_s6 = scalar_lea.sflag (!%p953_p5), [#allocation3], %s869_s30  ;;  %s875_s7 = scalar_lea.vmem (!%p953_p5), [#allocation2], %s463_s22 }
  0x51   : > { %677 = dma.done.wait (%p954_p0), %s171_s6, 128  }
  0x52   : > { %679 = vsyncadd (%p954_p0), %s171_s6, 4294967168  ;;  %p955_p11 = scmp.eq.s32.totalorder %s754_s16, 0 }
  0x54   : > { %681 = dma.done.wait (%p955_p11), [#allocation6], 2048   ;;  %p956_p1 = pmov %p955_p11 }
  0x55   : > { %v708_v0 = vmov 0   ;;  %v550_v1 = vld [vmem:[#allocation5 + $0x4] ss:$8 sps:$4 sm:$0xff]   ;;  %v552_v2 = vld [vmem:[#allocation5] ss:$8 sps:$4 sm:$0xff]   ;;  %v202_v17 = vld [vmem:[%s875_s7] sm:$0xff] }
  0x56   : > { %683 = vsyncadd (%p956_p1), [#allocation6], 4294965248  ;;  %332 = vmatprep.mubr.bf16.mxu0 %v708_v0  ;;  %300 = vmatprep.subr.bf16.mxu0 %v550_v1  ;;  %v553_v3 = vld [vmem:[#allocation5 + $0x14] ss:$8 sps:$4 sm:$0xff]   ;;  %v555_v4 = vld [vmem:[#allocation5 + $0x10] ss:$8 sps:$4 sm:$0xff]   ;;  %v203_v18 = vpack.c.bf16 %v202_v17, %v202_v17 }
  0x57   : > { %301 = vmatpush1.bf16.msra.mxu0 %v552_v2  ;;  %v556_v5 = vld [vmem:[#allocation5 + $0x24] ss:$8 sps:$4 sm:$0xff]   ;;  %v558_v6 = vld [vmem:[#allocation5 + $0x20] ss:$8 sps:$4 sm:$0xff]   ;;  %v559_v7 = vld [vmem:[#allocation5 + $0x34] ss:$8 sps:$4 sm:$0xff]  }
  0x58   : > { %302 = vmatprep.subr.bf16.mxu0 %v553_v3  ;;  %v561_v8 = vld [vmem:[#allocation5 + $0x30] ss:$8 sps:$4 sm:$0xff]   ;;  %v562_v9 = vld [vmem:[#allocation5 + $0x44] ss:$8 sps:$4 sm:$0xff]   ;;  %v564_v10 = vld [vmem:[#allocation5 + $0x40] ss:$8 sps:$4 sm:$0xff]  }
  0x59   : > { %v565_v11 = vld [vmem:[#allocation5 + $0x54] ss:$8 sps:$4 sm:$0xff]   ;;  %v567_v12 = vld [vmem:[#allocation5 + $0x50] ss:$8 sps:$4 sm:$0xff]   ;;  %v568_v13 = vld [vmem:[#allocation5 + $0x64] ss:$8 sps:$4 sm:$0xff]  }
  0x5a   : > { %v570_v14 = vld [vmem:[#allocation5 + $0x60] ss:$8 sps:$4 sm:$0xff]   ;;  %v571_v15 = vld [vmem:[#allocation5 + $0x74] ss:$8 sps:$4 sm:$0xff]   ;;  %v573_v16 = vld [vmem:[#allocation5 + $0x70] ss:$8 sps:$4 sm:$0xff]  }
  0x5b   : > { %303 = vmatpush1.bf16.msra.mxu0 %v555_v4  ;;  %s709_s18 = smov 64   ;;  %s710_s20 = smov 32   ;;  %v482_v28 = vld [vmem:[%s941_s2] ss:$0 sm:$0xff]  ;;  %vm360_vm0 = vcmask 130048  }
  0x5c   : > { %304 = vmatprep.subr.bf16.mxu0 %v556_v5  ;;  %s711_s4 = smov 16   ;;  %s484_s5 = sshll.u32 %s754_s16, 7 }
  0x5d   : > { %s200_s8 = scalar_lea.vmem [#allocation7], %s463_s22  ;;  %s895_s27 = scalar_lea.hbm %s942_s3, %s484_s5 }
  0x5e   : > { %s376_s9 = sshll.u32 %s200_s8, 4  ;;  %s363_s28 = scalar_lea.sflag [#allocation4], %s869_s30  ;;  %s897_s9 = int_to_ptr.vmem [resolvable:$true] %s376_s9 }
  0x5f   : > { %305 = vmatpush1.bf16.msra.mxu0 %v558_v6  ;;  %s632_s29 = scalar_lea.vmem %s897_s9, 128  ;;  %s712_s16 = smov [#allocation7]  }
  0x60   : > { %306 = vmatprep.subr.bf16.mxu0 %v559_v7  ;;  %p633_p4 = scmp.ne.s32.totalorder %s897_s9, %s632_s29  ;;  %s636_s23 = sshll.u32 %s712_s16, 4  ;;  %s637_s23 = int_to_ptr.vmem [resolvable:$false] %s636_s23 }
  0x61   : > { %s638_s22 = scalar_lea.vmem %s637_s23, 256  ;;  %p639_p10 = scmp.lt.s32.totalorder %s897_s9, %s637_s23 }
  0x62   : > { %p634_p6 = pnand %p633_p4, %p824_p12  ;;  %p640_p13 = scmp.lt.s32.totalorder %s638_s22, %s632_s29 }
  0x63   : > { %307 = vmatpush1.bf16.msra.mxu0 %v561_v8 }
  0x64   : > { %308 = vmatprep.subr.bf16.mxu0 %v562_v9  ;;  %p635_p8 = pneg %p634_p6  ;;  %p641_p3 = por %p640_p13, %p639_p10 }
  0x66   : > { %p642_p7 = pnand %p641_p3, %p635_p8 }
  0x67   : > { %309 = vmatpush1.bf16.msra.mxu0 %v564_v10 }
  0x68   : > { %310 = vmatprep.subr.bf16.mxu0 %v565_v11 }
  0x6b   : > { %311 = vmatpush1.bf16.msra.mxu0 %v567_v12 }
  0x6c   : > { %312 = vmatprep.subr.bf16.mxu0 %v568_v13 }
  0x6f   : > { %313 = vmatpush1.bf16.msra.mxu0 %v570_v14 }
  0x70   : > { %314 = vmatprep.subr.bf16.mxu0 %v571_v15 }
  0x73   : > { %315 = vmatpush1.bf16.msra.mxu0 %v573_v16 }
  0x76   : > { %333 = vmatmul.mubr.bf16.vlgmr.msra.gmra.mrb[0].mxu0 %v203_v18 }
 0x149   : > { %v334_v19 = vpop.f32.mrb[0].mxu0 }
 0x14a   : > { %v336_v20 = vpop.f32.mrb[1].mxu0 }
 0x14b   : > { %v341_v21 = vmax.f32 %v334_v19, %v336_v20  ;;  %v338_v22 = vpop.f32.mrb[2].mxu0 }
 0x14c   : > { %v339_v23 = vpop.f32.mrb[3].mxu0 }
 0x14d   : > { %342 = vrot.lane.b32.xlu0 %v341_v21, %s709_s18 }
 0x1bf   : > { %v343_v24 = vpop.permute.xlu0 %342 }
 0x1c0   : > { %v344_v25 = vmax.f32 %v341_v21, %v343_v24 }
 0x1c2   : > { %345 = vrot.lane.b32.xlu0 %v344_v25, %s710_s20 }
 0x234   : > { %v346_v26 = vpop.permute.xlu0 %345 }
 0x235   : > { %v347_v27 = vmax.f32 %v344_v25, %v346_v26 }
 0x237   : > { %348 = vrot.lane.b32.xlu1 %v347_v27, %s711_s4 }
 0x2a9   : > { %v349_v29 = vpop.permute.xlu1 %348 }
 0x2aa   : > { %v350_v30 = vmax.f32 %v347_v27, %v349_v29 }
 0x2ac   : > { %v358_v31 = vadd.f32 %v482_v28, %v350_v30 }
 0x2ae   : > { %v359_v32 = vmax.f32 %v358_v31, 0.0 }
 0x2b0   : > { %361 = vst.msk [vmem:[%s200_s8] sm:$0xff] %vm360_vm0, %v359_v32 }
 0x2b1   : > { %645 = shalt.err (!%p642_p7)
}
 0x2b2   : > { %s646_s30 = scalar_lea.hbm %s895_s27, 128  ;;  %s650_s18 = scalar_lea.hbm %s942_s3, 256 }
 0x2b3   : > { %p647_p9 = scmp.ne.s32.totalorder %s895_s27, %s646_s30  ;;  %p651_p0 = scmp.lt.u32.totalorder %s895_s27, %s942_s3 }
 0x2b4   : > { %p652_p11 = scmp.lt.u32.totalorder %s650_s18, %s646_s30  ;;  %p654_p4 = scmp.lt.u32.totalorder %s646_s30, %s895_s27 }
 0x2b5   : > { %p648_p2 = pnand %p647_p9, %p824_p12 }
 0x2b6   : > { %p653_p1 = por %p652_p11, %p651_p0 }
 0x2b7   : > { %p649_p5 = pneg %p648_p2 }
 0x2b8   : > { %p655_p6 = por %p654_p4, %p653_p1 }
 0x2ba   : > { %p656_p8 = pnand %p655_p6, %p649_p5 }
 0x2bc   : > { %659 = shalt.err (!%p656_p8)
}
 0x2bd   : > { %493 = dma.vmem_to_hbm [thread:$0]  (%p824_p12), %s897_s9, 128, %s895_s27, %s363_s28  }
 0x2be PF: > { %s388_s25 = sand.u32 1, %s690_s12   ;;  %p957_p10 = scmp.ne.s32.totalorder %s947_s19, 0 }
 0x2bf   : > { %p958_p13 = scmp.ge.s32.totalorder %s702_s15, 2  ;;  %s389_s26 = scalar_lea.sflag [#allocation4], %s388_s25 }
 0x2c1   : > { %p504_p3 = pnand %p958_p13, %p957_p10 }
 0x2c3   : > { %685 = dma.done.wait (!%p504_p3), %s389_s26, 128  }
 0x2c4   : > { %687 = vsyncadd (!%p504_p3), %s389_s26, 4294967168  ;;  %p17_p7 = scmp.ge.s32.totalorder %s789_s24, 4   ;;  %s959_s12 = smov %s694_s13 }
 0x2c5   : > { %s960_s13 = smov %s698_s14  ;;  %s961_s14 = smov %s820_s17 }
 0x2c6   : > { %s962_s15 = smov %s789_s24  ;;  %19 = sbr.rel (!%p17_p7) target bundleno = 6 (0x6), region = 81 }
 0x2cd   :  { %394 = vsyncpa [#allocation3], 1 }
 0x2ce   :  { %396 = vsyncpa [#allocation3 + $0x1], 1 }
 0x2cf   :  { %397 = vsyncpa [#allocation6], 1 }
 0x2d0   :  { %398 = vsyncpa [#allocation4], 1 }
 0x2d1   :  { %400 = vsyncpa [#allocation4 + $0x1], 1 }

</bundles_post_ra>
